<compile_context>
chip_gen: v7x
topology: tpu7x:2x2x1
jax: 0.10.0
libtpu: 0.0.40
codegen_flags: <defaults>
</compile_context>

<pallas_src>
import jax
import jax.numpy as jnp
from jax.experimental import pallas as pl
from jax.experimental.pallas import tpu as pltpu


def _bn_conv_kernel(x_ref, scale_ref, shift_ref, w_ref, b_ref, o_ref):
    # Fused BatchNorm2d (inference affine, folded to scale/shift) + 1x1 Conv2d.
    x = x_ref[...]                                    # [TM, E]
    xn = x * scale_ref[...] + shift_ref[...]          # per-channel BN affine (VPU)
    o_ref[...] = (jnp.dot(xn, w_ref[...], preferred_element_type=jnp.float32)
                  + b_ref[...])                       # [TM, Cpad] (MXU)


def _bilinear_kernel(g_ref, wr_ref, wct_ref, o_ref):
    # Separable bilinear interpolation (align_corners=False):
    #   out[g] = Wr @ plane_g @ Wc^T,  G planes per grid step (static unroll).
    # The second matmul (M = N = img) dominates FLOPs (img/P ~ 14x the first),
    # so per-plane matmuls already keep the MXU well fed while batching G
    # planes amortizes the per-grid-step overhead.
    G = g_ref.shape[0]
    wct = wct_ref[...]                                # [P, img]
    wr = wr_ref[...]                                  # [img, P]
    for gi in range(G):                               # G is small (<= 16)
        tmp = jnp.dot(g_ref[gi], wct,
                      preferred_element_type=jnp.float32)         # [P, img]
        o_ref[gi] = jnp.dot(wr, tmp,
                            preferred_element_type=jnp.float32)   # [img, img]


def _interp_matrix(out_size, in_size):
    # Weight matrix reproducing torch.nn.functional.interpolate(
    #   mode='bilinear', align_corners=False) along one axis.
    scale = in_size / out_size
    i = jnp.arange(out_size, dtype=jnp.float32)
    src = (i + 0.5) * scale - 0.5
    src = jnp.maximum(src, 0.0)                      # PyTorch clamps negative src
    i0 = jnp.minimum(jnp.floor(src).astype(jnp.int32), in_size - 1)
    i1 = jnp.minimum(i0 + 1, in_size - 1)
    frac = src - i0.astype(jnp.float32)
    w = (jax.nn.one_hot(i0, in_size, dtype=jnp.float32) * (1.0 - frac)[:, None]
         + jax.nn.one_hot(i1, in_size, dtype=jnp.float32) * frac[:, None])
    return w                                         # [out_size, in_size]


def _round_up(x, m):
    return ((x + m - 1) // m) * m


def _pick_plane_group(total_planes, img, *, vmem_budget_bytes=16 * 1024 * 1024,
                      max_unroll=16):
    # Largest divisor of total_planes whose double-buffered [G, img, img] f32
    # output block fits in the VMEM budget (and keeps the static unroll small).
    cap = max(1, vmem_budget_bytes // (2 * img * img * 4))
    cap = min(cap, max_unroll)
    g = 1
    for cand in range(1, total_planes + 1):
        if cand > cap:
            break
        if total_planes % cand == 0:
            g = cand
    return g


def linear_head_forward(features, image, params, *, embedding_size, num_classes,
                        row_tile=512):
    """features: [B, 1+P*P, E] float32; image: [B, 3, img, img] (only shape used)."""
    B, n_tok, E = features.shape
    assert E == embedding_size
    img = image.shape[-1]
    P = img // 14
    assert n_tok == 1 + P * P
    C = num_classes

    # ---- Fold BatchNorm2d (inference) into per-channel scale/shift. ----
    # TODO(synk): BatchNorm2d is reproduced in eval mode (running stats);
    # training-mode batch statistics are not computed here.
    inv_std = 1.0 / jnp.sqrt(params["bn_var"] + 1e-5)
    scale = (params["bn_gamma"] * inv_std).reshape(1, E)
    shift = (params["bn_beta"]
             - params["bn_mean"] * params["bn_gamma"] * inv_std).reshape(1, E)

    # 1x1 conv weight/bias, zero-padded on the class axis to a lane-dense 128.
    Cpad = _round_up(max(C, 1), 128)
    w = jnp.zeros((E, Cpad), jnp.float32).at[:, :C].set(
        params["conv_w"].reshape(C, E).T)
    b = jnp.zeros((1, Cpad), jnp.float32).at[:, :C].set(
        params["conv_b"].reshape(1, C))

    # Drop CLS token; PyTorch's permute+reshape maps token index -> (h, w)
    # row-major, which is exactly this [B*P*P, E] flat layout.
    N = B * P * P
    x = features[:, 1:, :].reshape(N, E).astype(jnp.float32)

    # Zero-pad the row axis so every tile is full (padded rows sliced off below).
    TM = min(row_tile, _round_up(N, 8))
    N_pad = _round_up(N, TM)
    if N_pad != N:
        x = jnp.pad(x, ((0, N_pad - N), (0, 0)))

    # ---- Kernel 1: fused BN + 1x1 conv, tiled over rows. ----
    grid_m = N_pad // TM
    cost1 = pl.CostEstimate(
        flops=2 * N_pad * E * Cpad,
        transcendentals=0,
        bytes_accessed=4 * (N_pad * E + N_pad * Cpad + E * Cpad + 2 * E + Cpad))
    logits_pad = pl.pallas_call(
        _bn_conv_kernel,
        out_shape=jax.ShapeDtypeStruct((N_pad, Cpad), jnp.float32),
        grid=(grid_m,),
        in_specs=[
            pl.BlockSpec((TM, E), lambda i: (i, 0)),     # x, streamed
            pl.BlockSpec((1, E), lambda i: (0, 0)),      # scale, resident
            pl.BlockSpec((1, E), lambda i: (0, 0)),      # shift, resident
            pl.BlockSpec((E, Cpad), lambda i: (0, 0)),   # conv weight, resident
            pl.BlockSpec((1, Cpad), lambda i: (0, 0)),   # conv bias, resident
        ],
        out_specs=pl.BlockSpec((TM, Cpad), lambda i: (i, 0)),
        compiler_params=pltpu.CompilerParams(dimension_semantics=("parallel",)),
        cost_estimate=cost1,
    )(x, scale, shift, w, b)

    # Glue (small: N*C elements, ~196x smaller than the final output):
    # drop padding, go to per-(batch, class)-plane layout.
    logits = logits_pad[:N, :C]
    grids = logits.reshape(B, P, P, C).transpose(0, 3, 1, 2).reshape(B * C, P, P)

    # ---- Kernel 2: bilinear upsample, G planes per grid step. ----
    wr = _interp_matrix(img, P)        # [img, P]  (built once)
    wct = wr.T                         # [P, img]
    G = _pick_plane_group(B * C, img)
    cost2 = pl.CostEstimate(
        flops=2 * B * C * (P * P * img + P * img * img),
        transcendentals=0,
        bytes_accessed=4 * (B * C * P * P + B * C * img * img + 2 * img * P))
    up = pl.pallas_call(
        _bilinear_kernel,
        out_shape=jax.ShapeDtypeStruct((B * C, img, img), jnp.float32),
        grid=(B * C // G,),
        in_specs=[
            pl.BlockSpec((G, P, P), lambda n: (n, 0, 0)),
            pl.BlockSpec((img, P), lambda n: (0, 0)),    # Wr, resident
            pl.BlockSpec((P, img), lambda n: (0, 0)),    # Wc^T, resident
        ],
        out_specs=pl.BlockSpec((G, img, img), lambda n: (n, 0, 0)),
        compiler_params=pltpu.CompilerParams(dimension_semantics=("parallel",)),
        cost_estimate=cost2,
    )(grids, wr, wct)

    return up.reshape(B, C, img, img)  # NCHW, like the PyTorch module


if __name__ == "__main__":
    B = 2
    E = 32          # embedding_size (small stand-in for 512), n_features = 1
    C = 3           # num_classes
    img = 28        # image side; patch grid P = img // 14 = 2
    P = img // 14
    n_tok = 1 + P * P

    key = jax.random.PRNGKey(0)
    k = jax.random.split(key, 8)
    features = jax.random.normal(k[0], (B, n_tok, E), dtype=jnp.float32)
    image = jax.random.normal(k[1], (B, 3, img, img), dtype=jnp.float32)

    params = {
        "bn_gamma": 1.0 + 0.1 * jax.random.normal(k[2], (E,), dtype=jnp.float32),
        "bn_beta": 0.1 * jax.random.normal(k[3], (E,), dtype=jnp.float32),
        "bn_mean": 0.1 * jax.random.normal(k[4], (E,), dtype=jnp.float32),
        "bn_var": jax.random.uniform(k[5], (E,), dtype=jnp.float32,
                                     minval=0.5, maxval=1.5),
        "conv_w": 0.05 * jax.random.normal(k[6], (C, E, 1, 1), dtype=jnp.float32),
        "conv_b": 0.05 * jax.random.normal(k[7], (C,), dtype=jnp.float32),
    }

    out = linear_head_forward(features, image, params,
                              embedding_size=E, num_classes=C)
    out = jax.block_until_ready(out)
    assert out.shape == (B, C, img, img)
    assert out.dtype == jnp.float32

    # Pure-JAX reference (same folded-BN / separable-interp math) to validate
    # the tiling / padding / class-padding added in this version.
    inv_std = 1.0 / jnp.sqrt(params["bn_var"] + 1e-5)
    sc = params["bn_gamma"] * inv_std
    sh = params["bn_beta"] - params["bn_mean"] * sc
    xr = features[:, 1:, :].reshape(B * P * P, E)
    lr = (xr * sc + sh) @ params["conv_w"].reshape(C, E).T + params["conv_b"]
    gref = lr.reshape(B, P, P, C).transpose(0, 3, 1, 2)
    wr_ref = _interp_matrix(img, P)
    ref = jnp.einsum("ih,bchw,jw->bcij", wr_ref, gref, wr_ref)
    assert jnp.allclose(out, ref, atol=1e-4, rtol=1e-4), \
        float(jnp.max(jnp.abs(out - ref)))

    print("KERNEL_OK")
</pallas_src>

<mosaic_0001>
module attributes {stable_mosaic.version = 11 : i64} {
  func.func @_bn_conv_kernel(%arg0: i32, %arg1: memref<8x32xf32, #tpu.memory_space<vmem>>, %arg2: memref<1x32xf32, #tpu.memory_space<vmem>>, %arg3: memref<1x32xf32, #tpu.memory_space<vmem>>, %arg4: memref<32x128xf32, #tpu.memory_space<vmem>>, %arg5: memref<1x128xf32, #tpu.memory_space<vmem>>, %arg6: memref<8x128xf32, #tpu.memory_space<vmem>>) attributes {dimension_semantics = [#tpu.dimension_semantics<parallel>], iteration_bounds = array<i64: 1>, scalar_prefetch = 0 : i64, scratch_operands = 0 : i64, tpu.core_type = #tpu.core_type<tc>, window_params = [{transform_indices = @transform_0, window_bounds = array<i64: 8, 32>}, {pipeline_mode = #tpu.pipeline_mode<synchronous>, transform_indices = @transform_1, window_bounds = array<i64: 1, 32>}, {pipeline_mode = #tpu.pipeline_mode<synchronous>, transform_indices = @transform_2, window_bounds = array<i64: 1, 32>}, {pipeline_mode = #tpu.pipeline_mode<synchronous>, transform_indices = @transform_3, window_bounds = array<i64: 32, 128>}, {pipeline_mode = #tpu.pipeline_mode<synchronous>, transform_indices = @transform_4, window_bounds = array<i64: 1, 128>}, {transform_indices = @transform_5, window_bounds = array<i64: 8, 128>}]} {
    %c0 = arith.constant 0 : index
    %c0_0 = arith.constant 0 : index
    %0 = vector.load %arg1[%c0, %c0_0] : memref<8x32xf32, #tpu.memory_space<vmem>>, vector<8x32xf32>
    %c0_1 = arith.constant 0 : index
    %c0_2 = arith.constant 0 : index
    %1 = vector.load %arg2[%c0_1, %c0_2] : memref<1x32xf32, #tpu.memory_space<vmem>>, vector<1x32xf32>
    %2 = vector.broadcast %1 : vector<1x32xf32> to vector<8x32xf32>
    %3 = arith.mulf %0, %2 : vector<8x32xf32>
    %c0_3 = arith.constant 0 : index
    %c0_4 = arith.constant 0 : index
    %4 = vector.load %arg3[%c0_3, %c0_4] : memref<1x32xf32, #tpu.memory_space<vmem>>, vector<1x32xf32>
    %5 = vector.broadcast %4 : vector<1x32xf32> to vector<8x32xf32>
    %6 = arith.addf %3, %5 : vector<8x32xf32>
    %c0_5 = arith.constant 0 : index
    %c0_6 = arith.constant 0 : index
    %7 = vector.load %arg4[%c0_5, %c0_6] : memref<32x128xf32, #tpu.memory_space<vmem>>, vector<32x128xf32>
    %cst = arith.constant dense<0.000000e+00> : vector<8x128xf32>
    %8 = tpu.matmul %6, %7, %cst {dimension_numbers = #tpu.dot_dimension_numbers<[1], [0], [0], [1], [0, 0, 1, 1], [], []>} : vector<8x32xf32>, vector<32x128xf32>, vector<8x128xf32> -> vector<8x128xf32>
    %c0_7 = arith.constant 0 : index
    %c0_8 = arith.constant 0 : index
    %9 = vector.load %arg5[%c0_7, %c0_8] : memref<1x128xf32, #tpu.memory_space<vmem>>, vector<1x128xf32>
    %10 = vector.broadcast %9 : vector<1x128xf32> to vector<8x128xf32>
    %11 = arith.addf %8, %10 : vector<8x128xf32>
    %c0_9 = arith.constant 0 : index
    %c0_10 = arith.constant 0 : index
    %12 = vector.load %arg6[%c0_9, %c0_10] : memref<8x128xf32, #tpu.memory_space<vmem>>, vector<8x128xf32>
    tpu.vector_store %arg6[%c0_9, %c0_10], %11 {strides = array<i32>} : memref<8x128xf32, #tpu.memory_space<vmem>>, vector<8x128xf32>,
    return
  }
  func.func @transform_0(%arg0: i32) -> (i32, i32) {
    %c0_i32 = arith.constant 0 : i32
    %c0_i32_0 = arith.constant 0 : i32
    return %arg0, %c0_i32 : i32, i32
  }
  func.func @transform_1(%arg0: i32) -> (i32, i32) {
    %c0_i32 = arith.constant 0 : i32
    %c0_i32_0 = arith.constant 0 : i32
    %c0_i32_1 = arith.constant 0 : i32
    return %c0_i32, %c0_i32_0 : i32, i32
  }
  func.func @transform_2(%arg0: i32) -> (i32, i32) {
    %c0_i32 = arith.constant 0 : i32
    %c0_i32_0 = arith.constant 0 : i32
    %c0_i32_1 = arith.constant 0 : i32
    return %c0_i32, %c0_i32_0 : i32, i32
  }
  func.func @transform_3(%arg0: i32) -> (i32, i32) {
    %c0_i32 = arith.constant 0 : i32
    %c0_i32_0 = arith.constant 0 : i32
    %c0_i32_1 = arith.constant 0 : i32
    return %c0_i32, %c0_i32_0 : i32, i32
  }
  func.func @transform_4(%arg0: i32) -> (i32, i32) {
    %c0_i32 = arith.constant 0 : i32
    %c0_i32_0 = arith.constant 0 : i32
    %c0_i32_1 = arith.constant 0 : i32
    return %c0_i32, %c0_i32_0 : i32, i32
  }
  func.func @transform_5(%arg0: i32) -> (i32, i32) {
    %c0_i32 = arith.constant 0 : i32
    %c0_i32_0 = arith.constant 0 : i32
    return %arg0, %c0_i32 : i32, i32
  }
}

</mosaic_0001>

<bundles_post_ra>
// kernel: tpu_custom_call.1
= control target key start
LH: loop header
LB: loop body
LE: loop exit
PB: predicated region body
PF: predicated region fallthrough
CT: control target
= control target key end

     0   :  { %10 = vsyncpa [#allocation3], 0  ;;  %s362_s0 = inlined_call_operand.hbm [shape: f32[8,32], index: 0, kind: input, shape index: {}]   ;;  %s363_s1 = inlined_call_operand.vmem [shape: f32[1,32], index: 1, kind: input, shape index: {}]   ;;  %s364_s2 = inlined_call_operand.vmem [shape: f32[1,32], index: 2, kind: input, shape index: {}]   ;;  %s365_s3 = inlined_call_operand.hbm [shape: f32[32,128], index: 3, kind: input, shape index: {}]   ;;  %s366_s4 = inlined_call_operand.vmem [shape: f32[1,128], index: 4, kind: input, shape index: {}]   ;;  %s367_s5 = inlined_call_operand.hbm [shape: f32[8,128], index: 5, kind: output, shape index: {}]  }
   0x1   :  { %11 = vsyncpa [#allocation6], 0 }
   0x2   :  { %12 = vsyncpa [#allocation4], 0  ;;  %s272_s18 = smov [#allocation2]   ;;  %s273_s20 = smov [#allocation5]  }
   0x3   :  { %s19_s19 = sshll.u32 %s272_s18, 4  ;;  %s32_s21 = sshll.u32 %s273_s20, 4  ;;  %s20_s19 = int_to_ptr.vmem [resolvable:$true] %s19_s19  ;;  %s310_s21 = int_to_ptr.vmem [resolvable:$true] %s32_s21 }
   0x4   :  { %s200_s24 = scalar_lea.hbm %s362_s0, 128 }
   0x5   :  { %p201_p0 = scmp.ne.s32.totalorder %s362_s0, %s200_s24  ;;  %p204_p1 = scmp.lt.u32.totalorder %s200_s24, %s362_s0 }
   0x7   :  { %p206_p2 = pnand %p204_p1, %p201_p0 }
   0x9   :  { %209 = shalt.err (!%p206_p2)
}
   0xa   :  { %s210_s29 = scalar_lea.vmem %s20_s19, 128  ;;  %p215_p4 = scmp.lt.s32.totalorder %s20_s19, %s20_s19 }
   0xb   :  { %p211_p3 = scmp.ne.s32.totalorder %s20_s19, %s210_s29  ;;  %p216_p5 = scmp.lt.s32.totalorder %s210_s29, %s210_s29 }
   0xd   :  { %p217_p6 = por %p216_p5, %p215_p4 }
   0xf   :  { %p218_p7 = pnand %p217_p6, %p211_p3 }
  0x11   :  { %221 = shalt.err (!%p218_p7)
}
  0x12   :  { %22 = dma.hbm_to_vmem [thread:$0]  %s362_s0, 128, %s20_s19, [#allocation3]  }
  0x13   :  { %s222_s9 = scalar_lea.hbm %s365_s3, 512 }
  0x14   :  { %p223_p8 = scmp.ne.s32.totalorder %s365_s3, %s222_s9  ;;  %p226_p9 = scmp.lt.u32.totalorder %s222_s9, %s365_s3 }
  0x16   :  { %p228_p10 = pnand %p226_p9, %p223_p8 }
  0x18   :  { %231 = shalt.err (!%p228_p10)
}
  0x19   :  { %s232_s14 = scalar_lea.vmem %s310_s21, 512  ;;  %p237_p12 = scmp.lt.s32.totalorder %s310_s21, %s310_s21 }
  0x1a   :  { %p233_p11 = scmp.ne.s32.totalorder %s310_s21, %s232_s14  ;;  %p238_p13 = scmp.lt.s32.totalorder %s232_s14, %s232_s14 }
  0x1c   :  { %p239_p0 = por %p238_p13, %p237_p12 }
  0x1e   :  { %p240_p1 = pnand %p239_p0, %p233_p11 }
  0x20   :  { %243 = shalt.err (!%p240_p1)
}
  0x21   :  { %s274_s0 = smov 128   ;;  %s275_s15 = smov 8  }
  0x22   :  { %38 = dma.hbm_to_vmem [thread:$0]  %s365_s3, 512, %s310_s21, [#allocation6], %s274_s0, %s274_s0, %s275_s15  }
  0x23   :  { %266 = dma.done.wait [#allocation3], 128  }
  0x24   :  { %267 = vsyncadd [#allocation3], 4294967168 }
  0x25   :  { %268 = dma.done.wait [#allocation6], 512  }
  0x26   :  { %269 = vsyncadd [#allocation6], 4294966784  ;;  %v276_v0 = vmov 0.0|0.0   ;;  %vm277_vm0 = vmmov 0   ;;  %v278_v1 = vmov 0.0   ;;  %v64_v2 = vld [vmem:[#allocation5] sm:$0xff] }
  0x27   :  { %186 = vmatprep.subr.bf16.mxu0 %v276_v0  ;;  %183 = vmatprep.mubr.msk.f32.mxu0 %vm277_vm0, %v278_v1  ;;  %v65_v3 = vld [vmem:[#allocation5 + $0x8] sm:$0xff]  ;;  %v66_v4 = vld [vmem:[#allocation5 + $0x10] sm:$0xff]  ;;  %v67_v6 = vld [vmem:[#allocation5 + $0x18] sm:$0xff]  ;;  %vm75_vm1 = vcmask 261120   ;;  %s279_s23 = smov [#allocation7]  }
  0x28   :  { %v187_v5 = vpack.c.bf16 %v65_v3, %v64_v2  ;;  %v47_v7 = vld [vmem:[#allocation2] sm:$0xff]  ;;  %v190_v10 = vpack.c.bf16 %v67_v6, %v66_v4  ;;  %s156_s24 = sshll.u32 %s279_s23, 4  ;;  %s157_s24 = int_to_ptr.vmem [resolvable:$true] %s156_s24 }
  0x29   :  { %v166_v8 = vld [vmem:[%s363_s1] ss:$0 sm:$0xff]  ;;  %s244_s1 = scalar_lea.vmem %s157_s24, 128  ;;  %p249_p3 = scmp.lt.s32.totalorder %s157_s24, %s157_s24 }
  0x2a   :  { %v55_v9 = vmul.f32 %v166_v8, %v47_v7  ;;  %188 = vmatpush3.bf16.msra.mxu0 %v187_v5  ;;  %v167_v11 = vld [vmem:[%s364_s2] ss:$0 sm:$0xff]  ;;  %p245_p2 = scmp.ne.s32.totalorder %s157_s24, %s244_s1  ;;  %p250_p4 = scmp.lt.s32.totalorder %s244_s1, %s244_s1 }
  0x2b   :  { %189 = vmatprep.subr.bf16.mxu0 %v276_v0  ;;  %v168_v13 = vld [vmem:[%s366_s4] ss:$0 sm:$0xff] }
  0x2c   :  { %v63_v12 = vadd.f32 %v167_v11, %v55_v9  ;;  %p251_p5 = por %p250_p4, %p249_p3 }
  0x2e   :  { %191 = vmatpush3.bf16.msra.mxu0 %v190_v10  ;;  %p252_p6 = pnand %p251_p5, %p245_p2 }
  0x31   :  { %184 = vmatmul.mubr.msk.f32.vlgmr.msra.gmra.mrb[0].mxu0 %vm75_vm1, %v63_v12 }
 0x104   :  { %v145_v14 = vpop.f32.mrb[0].mxu0 }
 0x105   :  { %v146_v15 = vadd.f32 %v168_v13, %v145_v14  ;;  %v185_v16 = vpop.f32.mrb[1].mxu0 }
 0x107   :  { %149 = vst [vmem:[#allocation7] sm:$0xff] %v146_v15 }
 0x108   :  { %255 = shalt.err (!%p252_p6)
}
 0x109   :  { %s256_s26 = scalar_lea.hbm %s367_s5, 128 }
 0x10a   :  { %p257_p7 = scmp.ne.s32.totalorder %s367_s5, %s256_s26  ;;  %p260_p8 = scmp.lt.u32.totalorder %s256_s26, %s367_s5 }
 0x10c   :  { %p262_p9 = pnand %p260_p8, %p257_p7 }
 0x10e   :  { %265 = shalt.err (!%p262_p9)
}
 0x10f   :  { %159 = dma.vmem_to_hbm [thread:$0]  %s157_s24, 128, %s367_s5, [#allocation4]  }
 0x110   :  { %270 = dma.done.wait [#allocation4], 128  }
 0x111   :  { %271 = vsyncadd [#allocation4], 4294967168 }
 0x112   :  { %163 = vsyncpa [#allocation3], 1 }
 0x113   :  { %164 = vsyncpa [#allocation6], 1 }
 0x114   :  { %165 = vsyncpa [#allocation4], 1 }

</bundles_post_ra>
